<compile_context>
chip_gen: v7x
topology: tpu7x:2x2x1
jax: 0.10.0
libtpu: 0.0.40
codegen_flags: <defaults>
</compile_context>

<pallas_src>
import math
from functools import partial

import jax
import jax.numpy as jnp
from jax.experimental import pallas as pl
from jax.experimental.pallas import tpu as pltpu

EPS = 1e-5                      # nn.GroupNorm default
_PAD = 128                      # lane-aligned guard region in the tap-partial scratch
_VMEM_LIMIT = 48 * 1024 * 1024  # > v5e's 16 MiB scoped default, < v7x's 64 MiB physical


def _halo_rows(W):
    """Smallest row count whose flattened span (rows*W) is a multiple of 128 lanes."""
    return 128 // math.gcd(W, 128)


# ------------------------------------------------------------------ pass 1: GroupNorm partial sums
def _stats_kernel(x_ref, sum_ref, sq_ref):
    x = x_ref[0].astype(jnp.float32)                          # (Cin, tile)
    sum_ref[0, 0] = jnp.sum(x, axis=1, keepdims=True)         # per-channel partial sum
    sq_ref[0, 0] = jnp.sum(x * x, axis=1, keepdims=True)      # per-channel partial sum of squares


def groupnorm_partial_sums(x_flat, *, hw_tile):
    """x_flat: (N, Cin, HW) -> per-(n, tile) partial (sum, sumsq), each (N, ns, Cin, 1) f32."""
    N, Cin, HW = x_flat.shape
    ns = HW // hw_tile
    return pl.pallas_call(
        _stats_kernel,
        out_shape=(jax.ShapeDtypeStruct((N, ns, Cin, 1), jnp.float32),
                   jax.ShapeDtypeStruct((N, ns, Cin, 1), jnp.float32)),
        grid=(N, ns),
        in_specs=[pl.BlockSpec((1, Cin, hw_tile), lambda n, s: (n, 0, s))],
        out_specs=(pl.BlockSpec((1, 1, Cin, 1), lambda n, s: (n, s, 0, 0)),
                   pl.BlockSpec((1, 1, Cin, 1), lambda n, s: (n, s, 0, 0))),
        compiler_params=pltpu.CompilerParams(
            dimension_semantics=("parallel", "parallel"),
            vmem_limit_bytes=_VMEM_LIMIT),
    )(x_flat)


# ----------------------------------------------- pass 2: fused normalize + SiLU + conv3x3 + bias
def _conv_kernel(*refs, W, TH, Cin, Cout, Cpad, halo_rows, has_halo, cdt):
    if has_halo:
        (xm_ref, xt_ref, xb_ref, sc_ref, sh_ref, w_ref, b_ref,
         o_ref, fbuf, pbuf) = refs
    else:
        xm_ref, sc_ref, sh_ref, w_ref, b_ref, o_ref, fbuf, pbuf = refs

    L = TH * W
    Lf = (TH + 2) * W

    scale = sc_ref[0].astype(jnp.float32)                     # (Cin, 1)
    shift = sh_ref[0].astype(jnp.float32)

    def norm_silu(v):                                         # GroupNorm affine + SiLU, f32 math
        y = v.astype(jnp.float32) * scale + shift
        # exp + reciprocal both land on the EUP slot
        return (y * pl.reciprocal(1.0 + jnp.exp(-y), approx=True)).astype(cdt)

    zero_row = jnp.zeros((Cin, W), cdt)

    # Staging buffer rows: [top halo row | TH band rows | bottom halo row]; no guard columns.
    fbuf[:, W:W + L] = norm_silu(xm_ref[0])
    if has_halo:
        b = pl.program_id(1)
        nb = pl.num_programs(1)
        top = xt_ref[0, :, (halo_rows - 1) * W:halo_rows * W]   # last row of the top halo chunk
        bot = xb_ref[0, :, 0:W]                                 # first row of the bottom halo chunk
        fbuf[:, 0:W] = jnp.where(b > 0, norm_silu(top), zero_row)
        fbuf[:, W + L:W + L + W] = jnp.where(b < nb - 1, norm_silu(bot), zero_row)
    else:
        fbuf[:, 0:W] = zero_row
        fbuf[:, W + L:W + L + W] = zero_row

    # Single stacked MXU matmul: result rows [t*Cpad, t*Cpad+Cout) are the partial conv outputs of
    # tap t = kh*3 + kw evaluated at every staging-buffer position (f32 accumulation).
    pbuf[:, _PAD:_PAD + Lf] = jnp.dot(w_ref[...], fbuf[...],
                                      preferred_element_type=jnp.float32)

    # Left/right image-border masks for the kw = 0/2 taps; they also kill the two reads that fall
    # into the (uninitialized) guard region of pbuf.
    col = jax.lax.broadcasted_iota(jnp.int32, (1, L), 1) % W
    mask_l = col != 0
    mask_r = col != W - 1

    acc = jnp.zeros((Cout, L), jnp.float32)
    for kh in range(3):
        for kw in range(3):
            t = kh * 3 + kw
            off = kh * W + (kw - 1)                           # tap offset in staging coordinates
            p = pbuf[t * Cpad:t * Cpad + Cout, _PAD + off:_PAD + off + L]   # (Cout, L)
            if kw == 0:
                p = jnp.where(mask_l, p, 0.0)
            elif kw == 2:
                p = jnp.where(mask_r, p, 0.0)
            acc = acc + p
    o_ref[0] = (acc + b_ref[...].astype(jnp.float32)).astype(o_ref.dtype)


def fused_gn_silu_conv3x3(x_flat, scale, shift, w_all, bias, *, H, W, row_tile,
                          Cout, Cpad, compute_dtype, out_dtype):
    N, Cin, HW = x_flat.shape
    TH = row_tile
    NB = H // TH
    L = TH * W
    Lf = (TH + 2) * W
    has_halo = NB > 1
    hr = _halo_rows(W)
    HC = hr * W                                               # minimal lane-aligned halo chunk

    kernel = partial(_conv_kernel, W=W, TH=TH, Cin=Cin, Cout=Cout, Cpad=Cpad,
                     halo_rows=hr, has_halo=has_halo, cdt=compute_dtype)

    in_specs = [pl.BlockSpec((1, Cin, L), lambda n, b: (n, 0, b))]
    inputs = [x_flat]
    if has_halo:
        thb = TH // hr                                        # halo chunks per band
        n_hc = H // hr                                        # halo chunks per image
        in_specs += [
            # chunk containing global row b*TH - 1 (clamped at the top edge; masked in-kernel)
            pl.BlockSpec((1, Cin, HC), lambda n, b: (n, 0, jnp.maximum(b * thb - 1, 0))),
            # chunk containing global row (b+1)*TH (clamped at the bottom edge; masked in-kernel)
            pl.BlockSpec((1, Cin, HC), lambda n, b: (n, 0, jnp.minimum((b + 1) * thb, n_hc - 1))),
        ]
        inputs += [x_flat, x_flat]
    in_specs += [
        pl.BlockSpec((1, Cin, 1), lambda n, b: (n, 0, 0)),
        pl.BlockSpec((1, Cin, 1), lambda n, b: (n, 0, 0)),
        pl.BlockSpec((9 * Cpad, Cin), lambda n, b: (0, 0)),
        pl.BlockSpec((Cout, 1), lambda n, b: (0, 0)),
    ]
    inputs += [scale, shift, w_all, bias]

    return pl.pallas_call(
        kernel,
        out_shape=jax.ShapeDtypeStruct((N, Cout, HW), out_dtype),
        grid=(N, NB),
        in_specs=in_specs,
        out_specs=pl.BlockSpec((1, Cout, L), lambda n, b: (n, 0, b)),
        scratch_shapes=[
            pltpu.VMEM((Cin, Lf), compute_dtype),                 # normalized staging rows
            pltpu.VMEM((9 * Cpad, Lf + 2 * _PAD), jnp.float32),   # stacked tap partials
        ],
        compiler_params=pltpu.CompilerParams(
            dimension_semantics=("parallel", "parallel"),
            vmem_limit_bytes=_VMEM_LIMIT),
    )(*inputs)


# ---------------------------------------------------------------------------------------- wrapper
def _pick_row_tile(H, W, Cin, Cout, Cpad, xbytes, cbytes, budget=24 << 20):
    """Largest band height dividing H that fits the VMEM budget (prefers TH=H -> no halo path)."""
    hr = _halo_rows(W)
    cands = [th for th in range(8, H + 1, 8)
             if H % th == 0 and (th * W) % 128 == 0 and (th == H or th % hr == 0)]
    if not cands:
        return None
    for th in sorted(cands, reverse=True):
        L, Lf = th * W, (th + 2) * W
        need = (2 * Cin * L * xbytes          # double-buffered input band
                + 2 * Cout * L * 4            # double-buffered output band
                + Cin * Lf * cbytes           # staging scratch
                + 9 * Cpad * (Lf + 2 * _PAD) * 4)  # tap-partial scratch
        if th < H:
            need += 4 * Cin * hr * W * xbytes  # two double-buffered halo chunks
        if need <= budget:
            return th
    return min(cands)


def _pick_stats_tile(HW, cap=4096):
    """Largest multiple-of-128 divisor of HW <= min(cap, HW//2) so the tile axis has >= 2 steps."""
    if HW % 128 != 0 or HW <= 256:
        return HW
    upper = min(cap, HW // 2)
    for t in range(upper - upper % 128, 127, -128):
        if HW % t == 0:
            return t
    return HW


def unet_output_layer(x, params, *, groups=32, row_tile=None, stats_tile=None,
                      compute_dtype=jnp.bfloat16):
    """x: (N, Cin, H, W) NCHW. params: gn_w/gn_b (Cin,), conv_w (Cout, Cin, 3, 3), conv_b (Cout,)."""
    N, Cin, H, W = x.shape
    Cout = params["conv_w"].shape[0]
    HW = H * W

    assert Cin % groups == 0, "GroupNorm requires Cin % groups == 0"
    assert H % 8 == 0, "H must be a multiple of 8"
    hr = _halo_rows(W)
    assert H % hr == 0, "H must be a multiple of the minimal halo-chunk row count"

    Cpad = max(8, ((Cout + 7) // 8) * 8)          # sublane-aligned per-tap row block

    if row_tile is None:
        row_tile = _pick_row_tile(H, W, Cin, Cout, Cpad, x.dtype.itemsize,
                                  jnp.dtype(compute_dtype).itemsize)
    assert row_tile is not None and row_tile % 8 == 0 and H % row_tile == 0
    assert (row_tile * W) % 128 == 0
    if H // row_tile > 1:
        assert row_tile % hr == 0, "row_tile must be a multiple of the halo-chunk row count"

    if stats_tile is None:
        stats_tile = _pick_stats_tile(HW)
    assert HW % stats_tile == 0 and (stats_tile % 128 == 0 or stats_tile == HW)

    # NCHW kept end-to-end: merging trailing dims is a layout-preserving (free) reshape.
    x_flat = x.reshape(N, Cin, HW)

    # ---- pass 1: partial sums -> per-channel affine (scale, shift); combine is O(N*Cin) JAX ----
    psum, psq = groupnorm_partial_sums(x_flat, hw_tile=stats_tile)
    gs = Cin // groups
    s = psum.sum(axis=1).reshape(N, groups, gs)
    q = psq.sum(axis=1).reshape(N, groups, gs)
    cnt = float(gs * HW)
    mean = s.sum(-1) / cnt                                    # (N, groups)
    var = jnp.maximum(q.sum(-1) / cnt - mean * mean, 0.0)     # E[x^2]-E[x]^2 in f32
    rstd = jax.lax.rsqrt(var + EPS)
    gamma = params["gn_w"].astype(jnp.float32)[None, :]       # (1, Cin)
    beta = params["gn_b"].astype(jnp.float32)[None, :]
    rstd_c = jnp.repeat(rstd, gs, axis=1)                     # (N, Cin)
    mean_c = jnp.repeat(mean, gs, axis=1)
    scale = (gamma * rstd_c)[..., None]                       # (N, Cin, 1)
    shift = (beta - mean_c * gamma * rstd_c)[..., None]       # (N, Cin, 1)

    # ---- pass 2: fused normalize + SiLU + conv3x3 + bias ---------------------------------------
    # OIHW -> stacked tap weights (9*Cpad, Cin): rows [t*Cpad, t*Cpad+Cout) hold tap t = kh*3+kw.
    w = params["conv_w"].astype(compute_dtype)
    w_t = jnp.transpose(w, (2, 3, 0, 1)).reshape(9, Cout, Cin)
    w_all = jnp.zeros((9, Cpad, Cin), compute_dtype).at[:, :Cout, :].set(w_t)
    w_all = w_all.reshape(9 * Cpad, Cin)
    bias = params["conv_b"].reshape(Cout, 1).astype(jnp.float32)

    out_flat = fused_gn_silu_conv3x3(
        x_flat, scale, shift, w_all, bias, H=H, W=W, row_tile=row_tile,
        Cout=Cout, Cpad=Cpad, compute_dtype=compute_dtype, out_dtype=x.dtype)
    return out_flat.reshape(N, Cout, H, W)


# -------------------------------------------------------------------------------------- reference
def reference(x, params, *, groups=32, eps=EPS):
    """Pure-JAX mirror of the PyTorch forward (GroupNorm -> SiLU -> Conv2d 3x3 pad=1)."""
    N, C, H, W = x.shape
    xg = x.reshape(N, groups, -1)
    mu = xg.mean(-1, keepdims=True)
    var = xg.var(-1, keepdims=True)
    xn = ((xg - mu) * jax.lax.rsqrt(var + eps)).reshape(N, C, H, W)
    xn = xn * params["gn_w"].reshape(1, C, 1, 1) + params["gn_b"].reshape(1, C, 1, 1)
    xs = jax.nn.silu(xn)
    y = jax.lax.conv_general_dilated(
        xs, params["conv_w"], window_strides=(1, 1), padding=((1, 1), (1, 1)),
        dimension_numbers=("NCHW", "OIHW", "NCHW"))
    return y + params["conv_b"].reshape(1, -1, 1, 1)


if __name__ == "__main__":
    # Small shapes consistent with the module: GroupNorm(32, Cin) => Cin % 32 == 0; Cout=4 (SD latent).
    N, Cin, Cout, H, W = 2, 32, 4, 16, 16

    key = jax.random.PRNGKey(0)
    ks = jax.random.split(key, 5)
    params = {
        "gn_w": 1.0 + 0.1 * jax.random.normal(ks[0], (Cin,), jnp.float32),
        "gn_b": 0.1 * jax.random.normal(ks[1], (Cin,), jnp.float32),
        "conv_w": 0.05 * jax.random.normal(ks[2], (Cout, Cin, 3, 3), jnp.float32),  # OIHW
        "conv_b": 0.05 * jax.random.normal(ks[3], (Cout,), jnp.float32),
    }
    x = jax.random.normal(ks[4], (N, Cin, H, W), jnp.float32)

    ref = reference(x, params)

    # Default tiling: one full-image band per grid step (halo path is dead code).
    out_a = jax.block_until_ready(jax.jit(unet_output_layer)(x, params))
    # Small tiles: exercises the shrunken halo path and the multi-tile stats path.
    fn_b = jax.jit(partial(unet_output_layer, row_tile=8, stats_tile=128))
    out_b = jax.block_until_ready(fn_b(x, params))

    for out in (out_a, out_b):
        assert out.shape == (N, Cout, H, W), out.shape
        rel_err = float(jnp.max(jnp.abs(out - ref)) / (jnp.max(jnp.abs(ref)) + 1e-6))
        assert rel_err < 5e-2, f"mismatch vs reference: normalized max err {rel_err}"
    print("KERNEL_OK")
</pallas_src>

<mosaic_0001>
module attributes {stable_mosaic.version = 11 : i64} {
  func.func @_stats_kernel(%arg0: i32, %arg1: i32, %arg2: memref<1x32x256xf32, #tpu.memory_space<vmem>>, %arg3: memref<1x1x32x1xf32, #tpu.memory_space<vmem>>, %arg4: memref<1x1x32x1xf32, #tpu.memory_space<vmem>>) attributes {dimension_semantics = [#tpu.dimension_semantics<parallel>, #tpu.dimension_semantics<parallel>], iteration_bounds = array<i64: 2, 1>, scalar_prefetch = 0 : i64, scratch_operands = 0 : i64, tpu.core_type = #tpu.core_type<tc>, window_params = [{transform_indices = @transform_0, window_bounds = array<i64: 1, 32, 256>}, {transform_indices = @transform_1, window_bounds = array<i64: 1, 1, 32, 1>}, {transform_indices = @transform_2, window_bounds = array<i64: 1, 1, 32, 1>}]} {
    %c0 = arith.constant 0 : index
    %c0_0 = arith.constant 0 : index
    %c0_1 = arith.constant 0 : index
    %0 = vector.load %arg2[%c0, %c0_0, %c0_1] : memref<1x32x256xf32, #tpu.memory_space<vmem>>, vector<1x32x256xf32>
    %1 = vector.shape_cast %0 : vector<1x32x256xf32> to vector<32x256xf32>
    %cst = arith.constant dense<0.000000e+00> : vector<32xf32>
    %2 = vector.multi_reduction <add>, %1, %cst [1] : vector<32x256xf32> to vector<32xf32>
    %3 = vector.shape_cast %2 : vector<32xf32> to vector<32x1xf32>
    %c0_2 = arith.constant 0 : index
    %c0_3 = arith.constant 0 : index
    %c0_4 = arith.constant 0 : index
    %c0_5 = arith.constant 0 : index
    %4 = vector.load %arg3[%c0_2, %c0_3, %c0_4, %c0_5] : memref<1x1x32x1xf32, #tpu.memory_space<vmem>>, vector<1x1x32x1xf32>
    %5 = vector.shape_cast %4 : vector<1x1x32x1xf32> to vector<32x1xf32>
    %6 = vector.shape_cast %3 : vector<32x1xf32> to vector<1x1x32x1xf32>
    tpu.vector_store %arg3[%c0_2, %c0_3, %c0_4, %c0_5], %6 {strides = array<i32>} : memref<1x1x32x1xf32, #tpu.memory_space<vmem>>, vector<1x1x32x1xf32>,
    %7 = arith.mulf %1, %1 : vector<32x256xf32>
    %cst_6 = arith.constant dense<0.000000e+00> : vector<32xf32>
    %8 = vector.multi_reduction <add>, %7, %cst_6 [1] : vector<32x256xf32> to vector<32xf32>
    %9 = vector.shape_cast %8 : vector<32xf32> to vector<32x1xf32>
    %c0_7 = arith.constant 0 : index
    %c0_8 = arith.constant 0 : index
    %c0_9 = arith.constant 0 : index
    %c0_10 = arith.constant 0 : index
    %10 = vector.load %arg4[%c0_7, %c0_8, %c0_9, %c0_10] : memref<1x1x32x1xf32, #tpu.memory_space<vmem>>, vector<1x1x32x1xf32>
    %11 = vector.shape_cast %10 : vector<1x1x32x1xf32> to vector<32x1xf32>
    %12 = vector.shape_cast %9 : vector<32x1xf32> to vector<1x1x32x1xf32>
    tpu.vector_store %arg4[%c0_7, %c0_8, %c0_9, %c0_10], %12 {strides = array<i32>} : memref<1x1x32x1xf32, #tpu.memory_space<vmem>>, vector<1x1x32x1xf32>,
    return
  }
  func.func @transform_0(%arg0: i32, %arg1: i32) -> (i32, i32, i32) {
    %c0_i32 = arith.constant 0 : i32
    %c0_i32_0 = arith.constant 0 : i32
    return %arg0, %c0_i32, %arg1 : i32, i32, i32
  }
  func.func @transform_1(%arg0: i32, %arg1: i32) -> (i32, i32, i32, i32) {
    %c0_i32 = arith.constant 0 : i32
    %c0_i32_0 = arith.constant 0 : i32
    %c0_i32_1 = arith.constant 0 : i32
    return %arg0, %arg1, %c0_i32, %c0_i32_0 : i32, i32, i32, i32
  }
  func.func @transform_2(%arg0: i32, %arg1: i32) -> (i32, i32, i32, i32) {
    %c0_i32 = arith.constant 0 : i32
    %c0_i32_0 = arith.constant 0 : i32
    %c0_i32_1 = arith.constant 0 : i32
    return %arg0, %arg1, %c0_i32, %c0_i32_0 : i32, i32, i32, i32
  }
}

module attributes {stable_mosaic.version = 11 : i64} {
  func.func @_conv_kernel(%arg0: i32, %arg1: i32, %arg2: memref<1x32x256xf32, #tpu.memory_space<vmem>>, %arg3: memref<1x32x1xf32, #tpu.memory_space<vmem>>, %arg4: memref<1x32x1xf32, #tpu.memory_space<vmem>>, %arg5: memref<72x32xbf16, #tpu.memory_space<vmem>>, %arg6: memref<4x1xf32, #tpu.memory_space<vmem>>, %arg7: memref<1x4x256xf32, #tpu.memory_space<vmem>>, %arg8: memref<32x288xbf16, #tpu.memory_space<vmem>>, %arg9: memref<72x544xf32, #tpu.memory_space<vmem>>) attributes {dimension_semantics = [#tpu.dimension_semantics<parallel>, #tpu.dimension_semantics<parallel>], iteration_bounds = array<i64: 2, 1>, scalar_prefetch = 0 : i64, scratch_operands = 2 : i64, tpu.core_type = #tpu.core_type<tc>, window_params = [{transform_indices = @transform_0, window_bounds = array<i64: 1, 32, 256>}, {transform_indices = @transform_1, window_bounds = array<i64: 1, 32, 1>}, {transform_indices = @transform_2, window_bounds = array<i64: 1, 32, 1>}, {pipeline_mode = #tpu.pipeline_mode<synchronous>, transform_indices = @transform_3, window_bounds = array<i64: 72, 32>}, {pipeline_mode = #tpu.pipeline_mode<synchronous>, transform_indices = @transform_4, window_bounds = array<i64: 4, 1>}, {transform_indices = @transform_5, window_bounds = array<i64: 1, 4, 256>}]} {
    %c0 = arith.constant 0 : index
    %c0_0 = arith.constant 0 : index
    %c0_1 = arith.constant 0 : index
    %0 = vector.load %arg3[%c0, %c0_0, %c0_1] : memref<1x32x1xf32, #tpu.memory_space<vmem>>, vector<1x32x1xf32>
    %1 = vector.shape_cast %0 : vector<1x32x1xf32> to vector<32x1xf32>
    %c0_2 = arith.constant 0 : index
    %c0_3 = arith.constant 0 : index
    %c0_4 = arith.constant 0 : index
    %2 = vector.load %arg4[%c0_2, %c0_3, %c0_4] : memref<1x32x1xf32, #tpu.memory_space<vmem>>, vector<1x32x1xf32>
    %3 = vector.shape_cast %2 : vector<1x32x1xf32> to vector<32x1xf32>
    %cst = arith.constant 0.000000e+00 : bf16
    %4 = vector.broadcast %cst : bf16 to vector<32x16xbf16>
    %c0_5 = arith.constant 0 : index
    %c0_6 = arith.constant 0 : index
    %c0_7 = arith.constant 0 : index
    %5 = vector.load %arg2[%c0_5, %c0_6, %c0_7] : memref<1x32x256xf32, #tpu.memory_space<vmem>>, vector<1x32x256xf32>
    %6 = vector.shape_cast %5 : vector<1x32x256xf32> to vector<32x256xf32>
    %7 = vector.broadcast %1 : vector<32x1xf32> to vector<32x256xf32>
    %8 = arith.mulf %6, %7 : vector<32x256xf32>
    %9 = vector.broadcast %3 : vector<32x1xf32> to vector<32x256xf32>
    %10 = arith.addf %8, %9 : vector<32x256xf32>
    %cst_8 = arith.constant 0.000000e+00 : f32
    %11 = vector.broadcast %cst_8 : f32 to vector<32x256xf32>
    %12 = arith.subf %11, %10 : vector<32x256xf32>
    %13 = math.exp %12 : vector<32x256xf32>
    %cst_9 = arith.constant 1.000000e+00 : f32
    %14 = vector.broadcast %cst_9 : f32 to vector<32x256xf32>
    %15 = arith.addf %14, %13 : vector<32x256xf32>
    %16 = tpu.reciprocal %15 {approx = true} : vector<32x256xf32> -> vector<32x256xf32>
    %17 = arith.mulf %10, %16 : vector<32x256xf32>
    %18 = arith.truncf %17 : vector<32x256xf32> to vector<32x256xbf16>
    %c0_10 = arith.constant 0 : index
    %c16 = arith.constant 16 : index
    %19 = vector.load %arg8[%c0_10, %c16] : memref<32x288xbf16, #tpu.memory_space<vmem>>, vector<32x256xbf16>
    tpu.vector_store %arg8[%c0_10, %c16], %18 {strides = array<i32>} : memref<32x288xbf16, #tpu.memory_space<vmem>>, vector<32x256xbf16>,
    %c0_11 = arith.constant 0 : index
    %c0_12 = arith.constant 0 : index
    %20 = vector.load %arg8[%c0_11, %c0_12] : memref<32x288xbf16, #tpu.memory_space<vmem>>, vector<32x16xbf16>
    tpu.vector_store %arg8[%c0_11, %c0_12], %4 {strides = array<i32>} : memref<32x288xbf16, #tpu.memory_space<vmem>>, vector<32x16xbf16>,
    %c0_13 = arith.constant 0 : index
    %c272 = arith.constant 272 : index
    %21 = vector.load %arg8[%c0_13, %c272] : memref<32x288xbf16, #tpu.memory_space<vmem>>, vector<32x16xbf16>
    tpu.vector_store %arg8[%c0_13, %c272], %4 {strides = array<i32>} : memref<32x288xbf16, #tpu.memory_space<vmem>>, vector<32x16xbf16>,
    %c0_14 = arith.constant 0 : index
    %c0_15 = arith.constant 0 : index
    %22 = vector.load %arg5[%c0_14, %c0_15] : memref<72x32xbf16, #tpu.memory_space<vmem>>, vector<72x32xbf16>
    %c0_16 = arith.constant 0 : index
    %c0_17 = arith.constant 0 : index
    %23 = vector.load %arg8[%c0_16, %c0_17] : memref<32x288xbf16, #tpu.memory_space<vmem>>, vector<32x288xbf16>
    %cst_18 = arith.constant dense<0.000000e+00> : vector<72x288xf32>
    %24 = tpu.matmul %22, %23, %cst_18 {dimension_numbers = #tpu.dot_dimension_numbers<[1], [0], [0], [1], [0, 0, 1, 1], [], []>} : vector<72x32xbf16>, vector<32x288xbf16>, vector<72x288xf32> -> vector<72x288xf32>
    %c0_19 = arith.constant 0 : index
    %c128 = arith.constant 128 : index
    %25 = vector.load %arg9[%c0_19, %c128] : memref<72x544xf32, #tpu.memory_space<vmem>>, vector<72x288xf32>
    tpu.vector_store %arg9[%c0_19, %c128], %24 {strides = array<i32>} : memref<72x544xf32, #tpu.memory_space<vmem>>, vector<72x288xf32>,
    %26 = tpu.iota {dimensions = array<i32: 1>} : vector<1x256xi32>
    %c16_i32 = arith.constant 16 : i32
    %c0_i32 = arith.constant 0 : i32
    %27 = arith.cmpi eq, %c16_i32, %c0_i32 : i32
    %c1_i32 = arith.constant 1 : i32
    %28 = arith.select %27, %c1_i32, %c16_i32 : i32
    %29 = vector.broadcast %28 : i32 to vector<1x256xi32>
    %30 = arith.remsi %26, %29 : vector<1x256xi32>
    %c0_i32_20 = arith.constant 0 : i32
    %31 = vector.broadcast %c0_i32_20 : i32 to vector<1x256xi32>
    %32 = arith.cmpi ne, %30, %31 : vector<1x256xi32>
    %c0_i32_21 = arith.constant 0 : i32
    %33 = vector.broadcast %c0_i32_21 : i32 to vector<1x256xi32>
    %34 = arith.cmpi slt, %30, %33 : vector<1x256xi32>
    %c0_i32_22 = arith.constant 0 : i32
    %35 = arith.cmpi slt, %28, %c0_i32_22 : i32
    %36 = vector.broadcast %35 : i1 to vector<1x256xi1>
    %37 = vector.broadcast %36 : vector<1x256xi1> to vector<1x256xi1>
    %38 = arith.xori %34, %37 : vector<1x256xi1>
    %39 = arith.andi %38, %32 : vector<1x256xi1>
    %40 = vector.broadcast %28 : i32 to vector<1x256xi32>
    %41 = arith.addi %30, %40 : vector<1x256xi32>
    %42 = arith.select %39, %41, %30 : vector<1x256xi1>, vector<1x256xi32>
    %c0_i32_23 = arith.constant 0 : i32
    %43 = vector.broadcast %c0_i32_23 : i32 to vector<1x256xi32>
    %44 = arith.cmpi ne, %42, %43 : vector<1x256xi32>
    %c15_i32 = arith.constant 15 : i32
    %45 = vector.broadcast %c15_i32 : i32 to vector<1x256xi32>
    %46 = arith.cmpi ne, %42, %45 : vector<1x256xi32>
    %cst_24 = arith.constant 0.000000e+00 : f32
    %47 = vector.broadcast %cst_24 : f32 to vector<4x256xf32>
    %c0_25 = arith.constant 0 : index
    %c127 = arith.constant 127 : index
    %48 = vector.load %arg9[%c0_25, %c127] : memref<72x544xf32, #tpu.memory_space<vmem>>, vector<4x256xf32>
    %cst_26 = arith.constant 0.000000e+00 : f32
    %49 = vector.shape_cast %44 : vector<1x256xi1> to vector<1x256xi1>
    %50 = vector.broadcast %49 : vector<1x256xi1> to vector<4x256xi1>
    %51 = vector.broadcast %cst_26 : f32 to vector<4x256xf32>
    %52 = arith.select %50, %48, %51 : vector<4x256xi1>, vector<4x256xf32>
    %53 = arith.addf %47, %52 : vector<4x256xf32>
    %c8 = arith.constant 8 : index
    %c128_27 = arith.constant 128 : index
    %54 = vector.load %arg9[%c8, %c128_27] : memref<72x544xf32, #tpu.memory_space<vmem>>, vector<4x256xf32>
    %55 = arith.addf %53, %54 : vector<4x256xf32>
    %c16_28 = arith.constant 16 : index
    %c129 = arith.constant 129 : index
    %56 = vector.load %arg9[%c16_28, %c129] : memref<72x544xf32, #tpu.memory_space<vmem>>, vector<4x256xf32>
    %cst_29 = arith.constant 0.000000e+00 : f32
    %57 = vector.shape_cast %46 : vector<1x256xi1> to vector<1x256xi1>
    %58 = vector.broadcast %57 : vector<1x256xi1> to vector<4x256xi1>
    %59 = vector.broadcast %cst_29 : f32 to vector<4x256xf32>
    %60 = arith.select %58, %56, %59 : vector<4x256xi1>, vector<4x256xf32>
    %61 = arith.addf %55, %60 : vector<4x256xf32>
    %c24 = arith.constant 24 : index
    %c143 = arith.constant 143 : index
    %62 = vector.load %arg9[%c24, %c143] : memref<72x544xf32, #tpu.memory_space<vmem>>, vector<4x256xf32>
    %cst_30 = arith.constant 0.000000e+00 : f32
    %63 = vector.shape_cast %44 : vector<1x256xi1> to vector<1x256xi1>
    %64 = vector.broadcast %63 : vector<1x256xi1> to vector<4x256xi1>
    %65 = vector.broadcast %cst_30 : f32 to vector<4x256xf32>
    %66 = arith.select %64, %62, %65 : vector<4x256xi1>, vector<4x256xf32>
    %67 = arith.addf %61, %66 : vector<4x256xf32>
    %c32 = arith.constant 32 : index
    %c144 = arith.constant 144 : index
    %68 = vector.load %arg9[%c32, %c144] : memref<72x544xf32, #tpu.memory_space<vmem>>, vector<4x256xf32>
    %69 = arith.addf %67, %68 : vector<4x256xf32>
    %c40 = arith.constant 40 : index
    %c145 = arith.constant 145 : index
    %70 = vector.load %arg9[%c40, %c145] : memref<72x544xf32, #tpu.memory_space<vmem>>, vector<4x256xf32>
    %cst_31 = arith.constant 0.000000e+00 : f32
    %71 = vector.shape_cast %46 : vector<1x256xi1> to vector<1x256xi1>
    %72 = vector.broadcast %71 : vector<1x256xi1> to vector<4x256xi1>
    %73 = vector.broadcast %cst_31 : f32 to vector<4x256xf32>
    %74 = arith.select %72, %70, %73 : vector<4x256xi1>, vector<4x256xf32>
    %75 = arith.addf %69, %74 : vector<4x256xf32>
    %c48 = arith.constant 48 : index
    %c159 = arith.constant 159 : index
    %76 = vector.load %arg9[%c48, %c159] : memref<72x544xf32, #tpu.memory_space<vmem>>, vector<4x256xf32>
    %cst_32 = arith.constant 0.000000e+00 : f32
    %77 = vector.shape_cast %44 : vector<1x256xi1> to vector<1x256xi1>
    %78 = vector.broadcast %77 : vector<1x256xi1> to vector<4x256xi1>
    %79 = vector.broadcast %cst_32 : f32 to vector<4x256xf32>
    %80 = arith.select %78, %76, %79 : vector<4x256xi1>, vector<4x256xf32>
    %81 = arith.addf %75, %80 : vector<4x256xf32>
    %c56 = arith.constant 56 : index
    %c160 = arith.constant 160 : index
    %82 = vector.load %arg9[%c56, %c160] : memref<72x544xf32, #tpu.memory_space<vmem>>, vector<4x256xf32>
    %83 = arith.addf %81, %82 : vector<4x256xf32>
    %c64 = arith.constant 64 : index
    %c161 = arith.constant 161 : index
    %84 = vector.load %arg9[%c64, %c161] : memref<72x544xf32, #tpu.memory_space<vmem>>, vector<4x256xf32>
    %cst_33 = arith.constant 0.000000e+00 : f32
    %85 = vector.shape_cast %46 : vector<1x256xi1> to vector<1x256xi1>
    %86 = vector.broadcast %85 : vector<1x256xi1> to vector<4x256xi1>
    %87 = vector.broadcast %cst_33 : f32 to vector<4x256xf32>
    %88 = arith.select %86, %84, %87 : vector<4x256xi1>, vector<4x256xf32>
    %89 = arith.addf %83, %88 : vector<4x256xf32>
    %c0_34 = arith.constant 0 : index
    %c0_35 = arith.constant 0 : index
    %90 = vector.load %arg6[%c0_34, %c0_35] : memref<4x1xf32, #tpu.memory_space<vmem>>, vector<4x1xf32>
    %91 = vector.broadcast %90 : vector<4x1xf32> to vector<4x256xf32>
    %92 = arith.addf %89, %91 : vector<4x256xf32>
    %c0_36 = arith.constant 0 : index
    %c0_37 = arith.constant 0 : index
    %c0_38 = arith.constant 0 : index
    %93 = vector.load %arg7[%c0_36, %c0_37, %c0_38] : memref<1x4x256xf32, #tpu.memory_space<vmem>>, vector<1x4x256xf32>
    %94 = vector.shape_cast %93 : vector<1x4x256xf32> to vector<4x256xf32>
    %95 = vector.shape_cast %92 : vector<4x256xf32> to vector<1x4x256xf32>
    tpu.vector_store %arg7[%c0_36, %c0_37, %c0_38], %95 {strides = array<i32>} : memref<1x4x256xf32, #tpu.memory_space<vmem>>, vector<1x4x256xf32>,
    return
  }
  func.func @transform_0(%arg0: i32, %arg1: i32) -> (i32, i32, i32) {
    %c0_i32 = arith.constant 0 : i32
    %c0_i32_0 = arith.constant 0 : i32
    return %arg0, %c0_i32, %arg1 : i32, i32, i32
  }
  func.func @transform_1(%arg0: i32, %arg1: i32) -> (i32, i32, i32) {
    %c0_i32 = arith.constant 0 : i32
    %c0_i32_0 = arith.constant 0 : i32
    %c0_i32_1 = arith.constant 0 : i32
    return %arg0, %c0_i32, %c0_i32_0 : i32, i32, i32
  }
  func.func @transform_2(%arg0: i32, %arg1: i32) -> (i32, i32, i32) {
    %c0_i32 = arith.constant 0 : i32
    %c0_i32_0 = arith.constant 0 : i32
    %c0_i32_1 = arith.constant 0 : i32
    return %arg0, %c0_i32, %c0_i32_0 : i32, i32, i32
  }
  func.func @transform_3(%arg0: i32, %arg1: i32) -> (i32, i32) {
    %c0_i32 = arith.constant 0 : i32
    %c0_i32_0 = arith.constant 0 : i32
    %c0_i32_1 = arith.constant 0 : i32
    return %c0_i32, %c0_i32_0 : i32, i32
  }
  func.func @transform_4(%arg0: i32, %arg1: i32) -> (i32, i32) {
    %c0_i32 = arith.constant 0 : i32
    %c0_i32_0 = arith.constant 0 : i32
    %c0_i32_1 = arith.constant 0 : i32
    return %c0_i32, %c0_i32_0 : i32, i32
  }
  func.func @transform_5(%arg0: i32, %arg1: i32) -> (i32, i32, i32) {
    %c0_i32 = arith.constant 0 : i32
    %c0_i32_0 = arith.constant 0 : i32
    return %arg0, %c0_i32, %arg1 : i32, i32, i32
  }
}

</mosaic_0001>

<bundles_post_ra>
// kernel: unet_output_layer.2
= control target key start
LH: loop header
LB: loop body
LE: loop exit
PB: predicated region body
PF: predicated region fallthrough
CT: control target
= control target key end

     0   :  { %s475_s9 = smov 0   ;;  %s477_s10 = smov 0   ;;  %s523_s0 = inlined_call_operand.vmem [shape: f32[2,32,256], index: 0, kind: input, shape index: {}]   ;;  %s524_s1 = inlined_call_operand.vmem [shape: f32[2,1,32,1], index: 1, kind: output, shape index: {0}]   ;;  %s525_s2 = inlined_call_operand.vmem [shape: f32[2,1,32,1], index: 2, kind: output, shape index: {1}]  }
   0x1   :  { %s479_s11 = smov 0  }
   0x2 LB: > { %s25_s12 = sadd.s32 1, %s454_s10  ;;  %p400_p0 = scmp.ge.s32.totalorder %s458_s11, 1  ;;  %s458_s11 = sphi %s479_s11, %s13_s11   ;;  %s454_s10 = sphi %s477_s10, %s527_s10   ;;  %s450_s9 = sphi %s475_s9, %s526_s9  }
   0x3   : > { %p27_p1 = scmp.ge.s32.totalorder %s25_s12, 2  ;;  %p138_p2 = scmp.lt.s32.totalorder %s458_s11, 3 }
   0x5   : > { %s529_s12 = smov (%p27_p1, %s25_s12), 0  ;;  %p139_p3 = pnand %p400_p0, %p138_p2 }
   0x6   : > { %p178_p4 = scmp.lt.s32.totalorder (!%p139_p3), %s450_s9, 1  ;;  %vm225_vm0 = vcmask (!%p139_p3), 7168  }
   0x7   : > { %142 = sbr.rel (%p139_p3) target bundleno = 176 (0xb0), region = 24 }
   0xe   : > { %s531_s9 = smov (!%p178_p4, %s450_s9), 1 }
   0xf   : > { %s409_s13 = sshll.u32 %s531_s9, 6  ;;  %s410_s17 = sshll.u32 %s531_s9, 5 }
  0x10   : > { %s185_s16 = scalar_lea.vmem %s523_s0, %s409_s13  ;;  %s195_s20 = scalar_lea.vmem %s524_s1, %s410_s17 }
  0x11   : > { %v209_v0 = vld [vmem:[%s185_s16 + $0x20] sm:$0xff]  ;;  %v210_v1 = vld [vmem:[%s185_s16 + $0x28] sm:$0xff]  ;;  %v211_v5 = vld [vmem:[%s185_s16 + $0x30] sm:$0xff]  ;;  %s204_s23 = scalar_lea.vmem %s525_s2, %s410_s17 }
  0x12   : > { %v205_v2 = vld [vmem:[%s185_s16] sm:$0xff]  ;;  %v219_v3 = vadd.f32 %v210_v1, %v209_v0  ;;  %v206_v4 = vld [vmem:[%s185_s16 + $0x8] sm:$0xff]  ;;  %v212_v6 = vld [vmem:[%s185_s16 + $0x38] sm:$0xff]  ;;  %v236_v17 = vmul.f32 %v211_v5, %v211_v5  ;;  %v234_v19 = vmul.f32 %v209_v0, %v209_v0  ;;  %v235_v20 = vmul.f32 %v210_v1, %v210_v1 }
  0x13   : > { %v213_v7 = vadd.f32 %v206_v4, %v205_v2  ;;  %v207_v8 = vld [vmem:[%s185_s16 + $0x10] sm:$0xff]  ;;  %v208_v9 = vld [vmem:[%s185_s16 + $0x18] sm:$0xff]  ;;  %v222_v10 = vadd.f32 %v212_v6, %v211_v5  ;;  %v230_v13 = vmul.f32 %v205_v2, %v205_v2  ;;  %v231_v14 = vmul.f32 %v206_v4, %v206_v4 }
  0x14   : > { %220 = vadd.xlane.f32.xlu1 %v219_v3  ;;  %v232_v11 = vmul.f32 %v207_v8, %v207_v8  ;;  %v233_v12 = vmul.f32 %v208_v9, %v208_v9  ;;  %v216_v15 = vadd.f32 %v208_v9, %v207_v8  ;;  %v237_v18 = vmul.f32 %v212_v6, %v212_v6 }
  0x15   : > { %214 = vadd.xlane.f32.xlu0 %v213_v7  ;;  %v238_v21 = vadd.f32 %v231_v14, %v230_v13  ;;  %v244_v23 = vadd.f32 %v235_v20, %v234_v19 }
  0x16   : > { %v241_v16 = vadd.f32 %v233_v12, %v232_v11  ;;  %v247_v22 = vadd.f32 %v237_v18, %v236_v17 }
  0x18   : > { %223 = vadd.xlane.f32.xlu1 %v222_v10 }
  0x19   : > { %217 = vadd.xlane.f32.xlu0 %v216_v15 }
  0x1c   : > { %242 = vadd.xlane.f32.xlu1 %v241_v16 }
  0x1d   : > { %239 = vadd.xlane.f32.xlu0 %v238_v21 }
  0x20   : > { %248 = vadd.xlane.f32.xlu1 %v247_v22 }
  0x21   : > { %245 = vadd.xlane.f32.xlu0 %v244_v23 }
  0xa1   : > { %v221_v24 = vpop.xlane.xlu1 %220 }
  0xa2   : > { %228 = vst.msk [vmem:[%s195_s20 + $0x10] sm:$0xff] %vm225_vm0, %v221_v24  ;;  %v215_v25 = vpop.xlane.xlu0 %214 }
  0xa3   : > { %226 = vst.msk [vmem:[%s195_s20] sm:$0xff] %vm225_vm0, %v215_v25 }
  0xa5   : > { %v224_v26 = vpop.xlane.xlu1 %223 }
  0xa6   : > { %229 = vst.msk [vmem:[%s195_s20 + $0x18] sm:$0xff] %vm225_vm0, %v224_v26  ;;  %v218_v27 = vpop.xlane.xlu0 %217 }
  0xa7   : > { %227 = vst.msk [vmem:[%s195_s20 + $0x8] sm:$0xff] %vm225_vm0, %v218_v27 }
  0xa9   : > { %v243_v28 = vpop.xlane.xlu1 %242 }
  0xaa   : > { %251 = vst.msk [vmem:[%s204_s23 + $0x8] sm:$0xff] %vm225_vm0, %v243_v28  ;;  %v240_v29 = vpop.xlane.xlu0 %239 }
  0xab   : > { %250 = vst.msk [vmem:[%s204_s23] sm:$0xff] %vm225_vm0, %v240_v29 }
  0xad   : > { %v249_v30 = vpop.xlane.xlu1 %248 }
  0xae   : > { %253 = vst.msk [vmem:[%s204_s23 + $0x18] sm:$0xff] %vm225_vm0, %v249_v30  ;;  %v246_v31 = vpop.xlane.xlu0 %245 }
  0xaf   : > { %252 = vst.msk [vmem:[%s204_s23 + $0x10] sm:$0xff] %vm225_vm0, %v246_v31 }
  0xb0 PF: > { %s13_s11 = sadd.s32 1, %s458_s11   ;;  %s526_s9 = smov %s454_s10 }
  0xb1   : > { %p10_p5 = scmp.ge.s32.totalorder %s13_s11, 4   ;;  %s527_s10 = smov %s529_s12 }
  0xb3   :  { %12 = sbr.rel (!%p10_p5) target bundleno = 2 (0x2), region = 66 }

// kernel: unet_output_layer.3
= control target key start
LH: loop header
LB: loop body
LE: loop exit
PB: predicated region body
PF: predicated region fallthrough
CT: control target
= control target key end

     0   :  { %s1234_s18 = smov 0   ;;  %s1236_s19 = smov 0   ;;  %s1401_s0 = inlined_call_operand.vmem [shape: f32[2,32,256], index: 0, kind: input, shape index: {}]   ;;  %s1402_s1 = inlined_call_operand.vmem [shape: f32[2,32,1], index: 1, kind: input, shape index: {}]   ;;  %s1403_s2 = inlined_call_operand.vmem [shape: f32[2,32,1], index: 2, kind: input, shape index: {}]   ;;  %s1404_s3 = inlined_call_operand.vmem [shape: bf16[72,32], index: 3, kind: input, shape index: {}]   ;;  %s1405_s4 = inlined_call_operand.vmem [shape: f32[4,1], index: 4, kind: input, shape index: {}]   ;;  %s1406_s5 = inlined_call_operand.vmem [shape: f32[2,4,256], index: 5, kind: output, shape index: {}]  }
   0x1   :  { %s1238_s20 = smov 0  }
   0x2 LB: > { %s27_s21 = sadd.s32 1, %s1186_s19  ;;  %p1032_p0 = scmp.ge.s32.totalorder %s1190_s20, 1  ;;  %s1190_s20 = sphi %s1238_s20, %s15_s20   ;;  %s1186_s19 = sphi %s1236_s19, %s1416_s19   ;;  %s1182_s18 = sphi %s1234_s18, %s1415_s18  }
   0x3   : > { %p29_p1 = scmp.ge.s32.totalorder %s27_s21, 2  ;;  %p228_p2 = scmp.lt.s32.totalorder %s1190_s20, 3 }
   0x5   : > { %s1418_s21 = smov (%p29_p1, %s27_s21), 0  ;;  %p229_p3 = pnand %p1032_p0, %p228_p2 }
   0x6   : > { %p275_p4 = scmp.lt.s32.totalorder (!%p229_p3), %s1182_s18, 1  ;;  %v1192_v0 = vmov (!%p229_p3), 0   ;;  %s1194_s8 = smov (!%p229_p3), 16   ;;  %vm1195_vm0 = vmmov (!%p229_p3), 0   ;;  %vm450_vm1 = vcmask (!%p229_p3), 1047680   ;;  %vm441_vm2 = vcmask (!%p229_p3), 130048  }
   0x7   : > { %232 = sbr.rel (%p229_p3) target bundleno = 714 (0x2ca), region = 40  ;;  %1130 = vset.pattern.permute.xlu1 (!%p229_p3), %v1192_v0  ;;  %1129 = vset.pattern.permute.xlu0 (!%p229_p3), %v1192_v0  ;;  %s1196_s9 = smov (!%p229_p3), 1   ;;  %vm460_vm3 = vcmask (!%p229_p3), 261248   ;;  %vm501_vm4 = vcmask (!%p229_p3), 261120   ;;  %vm744_vm5 = vcmask (!%p229_p3), 7168   ;;  %vm773_vm6 = vcmask (!%p229_p3), 1039360  }
   0x8   : > { %549 = vmatprep.mubr.bf16.mxu0 (!%p229_p3), %v1192_v0  ;;  %s1197_s26 = smov (!%p229_p3), 127   ;;  %s1198_s27 = smov (!%p229_p3), 113   ;;  %vm794_vm9 = vcmask (!%p229_p3), 924672   ;;  %vm834_vm12 = vcmask (!%p229_p3), 908288   ;;  %vm815_vm13 = vcmask (!%p229_p3), 916480   ;;  %vm855_vm14 = vcmask (!%p229_p3), 793600  }
   0x9   : > { %s1201_s30 = smov (!%p229_p3), 97   ;;  %s1202_s6 = smov (!%p229_p3), 96   ;;  %vm876_vm15 = vcmask (!%p229_p3), 785408  }
   0xe   : > { %s1420_s18 = smov (!%p275_p4, %s1182_s18), 1 }
   0xf   : > { %s1059_s22 = sshll.u32 %s1420_s18, 5  ;;  %s1058_s29 = sshll.u32 %s1420_s18, 6 }
  0x10   : > { %s293_s25 = scalar_lea.vmem %s1403_s2, %s1059_s22  ;;  %s288_s28 = scalar_lea.vmem %s1402_s1, %s1059_s22 }
  0x11   : > { %v309_v1 = vld [vmem:[%s293_s25] sm:$0xff]  ;;  %v310_v3 = vld [vmem:[%s293_s25 + $0x8] sm:$0xff]  ;;  %v308_v5 = vld [vmem:[%s288_s28 + $0x18] sm:$0xff]  ;;  %s282_s7 = scalar_lea.vmem %s1401_s0, %s1058_s29  ;;  %s1200_s29 = smov 111  }
  0x12   : > { %351 = vperm.xlu1 %1130, %v309_v1   ;;  %v305_v2 = vld [vmem:[%s288_s28] sm:$0xff]  ;;  %v306_v4 = vld [vmem:[%s288_s28 + $0x8] sm:$0xff]  ;;  %v307_v6 = vld [vmem:[%s288_s28 + $0x10] sm:$0xff]  ;;  %s1199_s28 = smov 112  }
  0x13   : > { %323 = vperm.xlu0 %1129, %v305_v2   ;;  %v312_v7 = vld [vmem:[%s293_s25 + $0x18] sm:$0xff]  ;;  %v311_v8 = vld [vmem:[%s293_s25 + $0x10] sm:$0xff]  ;;  %v313_v9 = vld [vmem:[%s282_s7] sm:$0xff] }
  0x14   : > { %v314_v10 = vld [vmem:[%s282_s7 + $0x8] sm:$0xff]  ;;  %v315_v15 = vld [vmem:[%s282_s7 + $0x10] sm:$0xff]  ;;  %v316_v16 = vld [vmem:[%s282_s7 + $0x18] sm:$0xff] }
  0x15   : > { %v319_v30 = vld [vmem:[%s282_s7 + $0x30] sm:$0xff]  ;;  %v320_v31 = vld [vmem:[%s282_s7 + $0x38] sm:$0xff]  ;;  %v317_v33 = vld [vmem:[%s282_s7 + $0x20] sm:$0xff] }
  0x16   : > { %356 = vperm.xlu1 %1130, %v310_v3   ;;  %v318_v34 = vld [vmem:[%s282_s7 + $0x28] sm:$0xff]  ;;  %s1203_s7 = smov 95  }
  0x17   : > { %328 = vperm.xlu0 %1129, %v306_v4  }
  0x1a   : > { %338 = vperm.xlu1 %1130, %v308_v5  }
  0x1b   : > { %333 = vperm.xlu0 %1129, %v307_v6  }
  0x1e   : > { %366 = vperm.xlu1 %1130, %v312_v7  }
  0x1f   : > { %361 = vperm.xlu0 %1129, %v311_v8  }
  0x91   : > { %v352_v11 = vpop.permute.xlu1 %351 }
  0x92   : > { %v324_v12 = vpop.permute.xlu0 %323 }
  0x93   : > { %v341_v13 = vmul.f32 %v324_v12, %v313_v9  ;;  %v342_v14 = vmul.f32 %v324_v12, %v314_v10 }
  0x95   : > { %v1268_v17 = vadd.f32 %v352_v11, %v341_v13  ;;  %v1270_v18 = vadd.f32 %v352_v11, %v342_v14  ;;  %v357_v19 = vpop.permute.xlu1 %356 }
  0x96   : > { %v329_v20 = vpop.permute.xlu0 %328 }
  0x97   : > { %v377_v21 = vsub.f32 0.0, %v1268_v17  ;;  %v378_v22 = vsub.f32 0.0, %v1270_v18  ;;  %v343_v23 = vmul.f32 %v329_v20, %v315_v15  ;;  %v344_v24 = vmul.f32 %v329_v20, %v316_v16 }
  0x98   : > { %v1193_v20 = vmov 0.0  }
  0x99   : > { %v385_v25 = vmul.f32 1.442695, %v377_v21  ;;  %v387_v26 = vmul.f32 1.442695, %v378_v22  ;;  %v1274_v27 = vadd.f32 %v357_v19, %v343_v23  ;;  %v1276_v28 = vadd.f32 %v357_v19, %v344_v24  ;;  %v339_v29 = vpop.permute.xlu1 %338  ;;  %1069 = vmatprep.subr.bf16.mxu1 %v1193_v20  ;;  %1073 = vmatprep.mubr.msk.bf16.mxu1 %vm1195_vm0, %v1193_v20 }
  0x9a   : > { %v334_v32 = vpop.permute.xlu0 %333  ;;  %v347_v37 = vmul.f32 %v339_v29, %v319_v30  ;;  %v348_v38 = vmul.f32 %v339_v29, %v320_v31 }
  0x9b   : > { %1136 = vpow2.f32 %v385_v25  ;;  %v379_v35 = vsub.f32 0.0, %v1274_v27  ;;  %v380_v36 = vsub.f32 0.0, %v1276_v28  ;;  %v345_v41 = vmul.f32 %v334_v32, %v317_v33 }
  0x9c   : > { %1138 = vpow2.f32 %v387_v26  ;;  %v346_v42 = vmul.f32 %v334_v32, %v318_v34  ;;  %v904_v32 = vld [vmem:[%s1405_s4] sm:$0xf] }
  0x9d   : > { %v389_v39 = vmul.f32 1.442695, %v379_v35  ;;  %v391_v40 = vmul.f32 1.442695, %v380_v36  ;;  %v367_v43 = vpop.permute.xlu1 %366 }
  0x9e   : > { %v375_v44 = vadd.f32 %v367_v43, %v347_v37  ;;  %v376_v45 = vadd.f32 %v367_v43, %v348_v38  ;;  %v362_v46 = vpop.permute.xlu0 %361 }
  0x9f   : > { %1140 = vpow2.f32 %v389_v39  ;;  %v373_v47 = vadd.f32 %v362_v46, %v345_v41  ;;  %v374_v48 = vadd.f32 %v362_v46, %v346_v42  ;;  %v1131_v42 = vld [vmem:[%s1404_s3] sm:$0xff]   ;;  %v1134_v46 = vld [vmem:[%s1404_s3 + $0x18] sm:$0xff]  }
  0xa0   : > { %1142 = vpow2.f32 %v391_v40  ;;  %v383_v49 = vsub.f32 0.0, %v375_v44  ;;  %v384_v50 = vsub.f32 0.0, %v376_v45 }
  0xa1   : > { %v381_v51 = vsub.f32 0.0, %v373_v47  ;;  %v382_v52 = vsub.f32 0.0, %v374_v48 }
  0xa2   : > { %v397_v53 = vmul.f32 1.442695, %v383_v49  ;;  %v399_v54 = vmul.f32 1.442695, %v384_v50 }
  0xa3   : > { %v393_v55 = vmul.f32 1.442695, %v381_v51  ;;  %v395_v56 = vmul.f32 1.442695, %v382_v52 }
  0xa4   : > { %1144 = vpow2.f32 %v397_v53 }
  0xa5   : > { %v1137_v57 = vpop.eup %1136  ;;  %1146 = vpow2.f32 %v399_v54 }
  0xa6   : > { %v1139_v58 = vpop.eup %1138  ;;  %v401_v59 = vadd.f32 1.0, %v1137_v57  ;;  %1148 = vpow2.f32 %v393_v55 }
  0xa7   : > { %v402_v60 = vadd.f32 1.0, %v1139_v58  ;;  %1150 = vpow2.f32 %v395_v56 }
  0xa8   : > { %1152 = vrcp.f32 %v401_v59 }
  0xa9   : > { %v1141_v61 = vpop.eup %1140  ;;  %1154 = vrcp.f32 %v402_v60 }
  0xaa   : > { %v1143_v62 = vpop.eup %1142  ;;  %v403_v63 = vadd.f32 1.0, %v1141_v61 }
  0xab   : > { %v404_v1 = vadd.f32 1.0, %v1143_v62 }
  0xac   : > { %1156 = vrcp.f32 %v403_v63 }
  0xad   : > { %1158 = vrcp.f32 %v404_v1 }
  0xae   : > { %v1145_v2 = vpop.eup %1144 }
  0xaf   : > { %v1147_v3 = vpop.eup %1146  ;;  %v407_v4 = vadd.f32 1.0, %v1145_v2 }
  0xb0   : > { %v1149_v5 = vpop.eup %1148  ;;  %v408_v6 = vadd.f32 1.0, %v1147_v3 }
  0xb1   : > { %v1151_v7 = vpop.eup %1150  ;;  %1160 = vrcp.f32 %v407_v4  ;;  %v405_v8 = vadd.f32 1.0, %v1149_v5 }
  0xb2   : > { %1162 = vrcp.f32 %v408_v6  ;;  %v406_v9 = vadd.f32 1.0, %v1151_v7  ;;  %v1153_v10 = vpop.eup %1152 }
  0xb3   : > { %1164 = vrcp.f32 %v405_v8  ;;  %v1155_v11 = vpop.eup %1154  ;;  %v417_v14 = vmul.f32 %v1153_v10, %v1268_v17 }
  0xb4   : > { %1166 = vrcp.f32 %v406_v9  ;;  %v418_v16 = vmul.f32 %v1155_v11, %v1270_v18 }
  0xb6   : > { %v1157_v12 = vpop.eup %1156 }
  0xb7   : > { %v1159_v13 = vpop.eup %1158  ;;  %v419_v15 = vmul.f32 %v1157_v12, %v1274_v27 }
  0xb8   : > { %v420_v19 = vmul.f32 %v1159_v13, %v1276_v28  ;;  %v728_v28 = vld [vmem:[#allocation3] sm:$0xf] }
  0xb9   : > { %v425_v21 = vpack.c.bf16 %v419_v15, %v417_v14 }
  0xba   : > { %v426_v22 = vpack.c.bf16 %v420_v19, %v418_v16 }
  0xbb   : > { %v1161_v23 = vpop.eup %1160  ;;  %433 = vrot.lane.b32.xlu0 %v425_v21, %s1194_s8 }
  0xbc   : > { %v1163_v24 = vpop.eup %1162  ;;  %v423_v25 = vmul.f32 %v1161_v23, %v375_v44  ;;  %435 = vrot.lane.b32.xlu1 %v426_v22, %s1194_s8  ;;  %v1132_v44 = vld [vmem:[%s1404_s3 + $0x8] sm:$0xff]  }
  0xbd   : > { %v1165_v26 = vpop.eup %1164  ;;  %v424_v29 = vmul.f32 %v1163_v24, %v376_v45  ;;  %v1133_v45 = vld [vmem:[%s1404_s3 + $0x10] sm:$0xff]  }
  0xbe   : > { %v1167_v17 = vpop.eup %1166  ;;  %v421_v30 = vmul.f32 %v1165_v26, %v373_v47  ;;  %v1135_v47 = vld [vmem:[%s1404_s3 + $0x20] ss:$0 sps:$4 sm:$0xff]  }
  0xbf   : > { %v422_v27 = vmul.f32 %v1167_v17, %v374_v48 }
  0xc0   : > { %v427_v31 = vpack.c.bf16 %v423_v25, %v421_v30 }
  0xc1   : > { %v428_v18 = vpack.c.bf16 %v424_v29, %v422_v27 }
  0xc2   : > { %437 = vrot.lane.b32.xlu0 %v427_v31, %s1194_s8 }
  0xc3   : > { %439 = vrot.lane.b32.xlu1 %v428_v18, %s1194_s8  ;;  %s1061_s8 = sshll.u32 %s1420_s18, 3 }
  0xc4   : > { %s302_s11 = scalar_lea.vmem %s1406_s5, %s1061_s8 }
  0xc6   : > { %738 = vrot.lane.b32.xlu0 %v728_v28, %s1196_s9 }
  0xca   : > { %907 = vperm.xlu0 %1129, %v904_v32  }
 0x12d   : > { %v434_v33 = vpop.permute.xlu0 %433 }
 0x12e   : > { %v436_v34 = vpop.permute.xlu1 %435  ;;  %451 = vst.msk [vmem:[#allocation2] sm:$0xff] %vm450_vm1, %v434_v33 }
 0x12f   : > { %454 = vst.msk [vmem:[#allocation2 + $0x10] sm:$0xff] %vm441_vm2, %v436_v34  ;;  %v442_v35 = vsel %vm441_vm2, %v434_v33, %v436_v34  ;;  %458 = vst.msk [vmem:[#allocation2] sm:$0xff] %vm441_vm2, %v1192_v0 }
 0x130   : > { %461 = vst.msk [vmem:[#allocation2 + $0x10] sm:$0xff] %vm460_vm3, %v1192_v0  ;;  %517 = vmatprep.subr.bf16.mxu0 %v442_v35 }
 0x134   : > { %v438_v36 = vpop.permute.xlu0 %437 }
 0x135   : > { %v440_v37 = vpop.permute.xlu1 %439  ;;  %455 = vst.msk [vmem:[#allocation2 + $0x18] sm:$0xff] %vm450_vm1, %v438_v36 }
 0x136   : > { %457 = vst.msk [vmem:[#allocation2 + $0x28] sm:$0xff] %vm441_vm2, %v440_v37  ;;  %v443_v38 = vsel %vm441_vm2, %v438_v36, %v440_v37  ;;  %459 = vst.msk [vmem:[#allocation2 + $0x18] sm:$0xff] %vm441_vm2, %v1192_v0  ;;  %v472_v39 = vld [vmem:[#allocation2] sm:$0xff] }
 0x137   : > { %462 = vst.msk [vmem:[#allocation2 + $0x28] sm:$0xff] %vm460_vm3, %v1192_v0  ;;  %v474_v40 = vld [vmem:[#allocation2 + $0x10] sm:$0xff]  ;;  %518 = vmatpush1.bf16.msra.mxu0 %v472_v39 }
 0x138   : > { %1070 = vmatpush3.bf16.msra.mxu1 %v474_v40  ;;  %519 = vmatprep.subr.bf16.mxu0 %v443_v38 }
 0x139   : > { %1071 = vmatprep.subr.bf16.mxu1 %v1193_v20 }
 0x13d   : > { %v475_v41 = vld [vmem:[#allocation2 + $0x18] sm:$0xff] }
 0x13e   : > { %v477_v43 = vld [vmem:[#allocation2 + $0x28] sm:$0xff]  ;;  %520 = vmatpush1.bf16.msra.mxu0 %v475_v41 }
 0x13f   : > { %1072 = vmatpush3.bf16.msra.mxu1 %v477_v43 }
 0x141   : > { %1046 = vmatmul.mubr.msk.bf16.vlgmr.msra.gmra.mrb[0].mxu0 %vm501_vm4, %v1131_v42 }
 0x142   : > { %1074 = vmatmul.mubr.msk.bf16.vlgmr.msra.gmra.mrb[0].mxu1 %vm501_vm4, %v1131_v42  ;;  %559 = vmatprep.mubr.bf16.mxu0 %v1192_v0 }
 0x143   : > { %1077 = vmatprep.mubr.msk.bf16.mxu1 %vm1195_vm0, %v1193_v20 }
 0x149   : > { %1047 = vmatmul.mubr.msk.bf16.gmra.mrb[4].mxu0 %vm501_vm4, %v1132_v44 }
 0x14a   : > { %1078 = vmatmul.mubr.msk.bf16.gmra.mrb[4].mxu1 %vm501_vm4, %v1132_v44  ;;  %569 = vmatprep.mubr.bf16.mxu0 %v1192_v0 }
 0x14b   : > { %1081 = vmatprep.mubr.msk.bf16.mxu1 %vm1195_vm0, %v1193_v20 }
 0x151   : > { %1048 = vmatmul.mubr.msk.bf16.gmra.mrb[8].mxu0 %vm501_vm4, %v1133_v45 }
 0x152   : > { %1082 = vmatmul.mubr.msk.bf16.gmra.mrb[8].mxu1 %vm501_vm4, %v1133_v45  ;;  %579 = vmatprep.mubr.bf16.mxu0 %v1192_v0 }
 0x153   : > { %1085 = vmatprep.mubr.msk.bf16.mxu1 %vm1195_vm0, %v1193_v20 }
 0x159   : > { %1049 = vmatmul.mubr.msk.bf16.gmra.mrb[12].mxu0 %vm501_vm4, %v1134_v46 }
 0x15a   : > { %1086 = vmatmul.mubr.msk.bf16.gmra.mrb[12].mxu1 %vm501_vm4, %v1134_v46  ;;  %589 = vmatprep.mubr.bf16.mxu0 %v1192_v0 }
 0x15b   : > { %1089 = vmatprep.mubr.msk.bf16.mxu1 %vm1195_vm0, %v1193_v20  ;;  %vm895_vm0 = vcmask 777216  }
 0x161   : > { %1050 = vmatmul.mubr.msk.bf16.gmra.mrb[16].mxu0 %vm501_vm4, %v1135_v47 }
 0x162   : > { %1090 = vmatmul.mubr.msk.bf16.gmra.mrb[16].mxu1 %vm501_vm4, %v1135_v47  ;;  %v739_v47 = vpop.permute.xlu0 %738 }
 0x214   : > { %v551_v48 = vpop.f32.mrb[0].mxu0 }
 0x215   : > { %v632_v49 = vpop.f32.mrb[0].mxu1  ;;  %670 = vst [vmem:[#allocation3 + $0x8] sm:$0xff] %v551_v48  ;;  %v553_v50 = vpop.f32.mrb[1].mxu0 }
 0x216   : > { %v1075_v51 = vpop.f32.mrb[1].mxu1  ;;  %671 = vst [vmem:[#allocation3 + $0x10] sm:$0xff] %v553_v50  ;;  %v555_v52 = vpop.f32.mrb[2].mxu0 }
 0x217   : > { %v635_v53 = vpop.f32.mrb[2].mxu1  ;;  %673 = vst [vmem:[#allocation3 + $0x30] sm:$0xff] %v555_v52  ;;  %v557_v0 = vpop.f32.mrb[3].mxu0 }
 0x218   : > { %v1076_v54 = vpop.f32.mrb[3].mxu1  ;;  %674 = vst [vmem:[#allocation3 + $0x38] sm:$0xff] %v557_v0  ;;  %v1344_v48 = vpop.permute.xlu0 %907 }
 0x219   : > { %v697_v54 = vlaneseq }
 0x21c   : > { %v561_v55 = vpop.f32.mrb[4].mxu0  ;;  %v729_v56 = vld [vmem:[#allocation3 + $0x8] sm:$0xf] }
 0x21d   : > { %v640_v57 = vpop.f32.mrb[4].mxu1  ;;  %676 = vst [vmem:[#allocation3 + $0x58] sm:$0xff] %v561_v55  ;;  %740 = vrot.lane.b32.xlu1 %v729_v56, %s1196_s9  ;;  %v563_v58 = vpop.f32.mrb[5].mxu0  ;;  %v730_v59 = vld [vmem:[#allocation3 + $0x10] sm:$0xf] }
 0x21e   : > { %678 = vst.msk [vmem:[#allocation3 + $0x68] sm:$0xff] %vm501_vm4, %v640_v57  ;;  %v1079_v60 = vpop.f32.mrb[5].mxu1  ;;  %677 = vst [vmem:[#allocation3 + $0x60] sm:$0xff] %v563_v58  ;;  %742 = vrot.lane.b32.xlu0 %v730_v59, %s1196_s9  ;;  %v565_v61 = vpop.f32.mrb[6].mxu0  ;;  %v698_v57 = vand.u32 127, %v697_v54 }
 0x21f   : > { %v643_v62 = vpop.f32.mrb[6].mxu1  ;;  %679 = vst [vmem:[#allocation3 + $0x80] sm:$0xff] %v565_v61  ;;  %v567_v63 = vpop.f32.mrb[7].mxu0 }
 0x220   : > { %681 = vst.msk [vmem:[#allocation3 + $0x90] sm:$0xff] %vm501_vm4, %v643_v62  ;;  %v1080_v1 = vpop.f32.mrb[7].mxu1  ;;  %680 = vst [vmem:[#allocation3 + $0x88] sm:$0xff] %v567_v63  ;;  %v699_v60 = vadd.s32 128, %v698_v57  ;;  %v704_v63 = vand.u32 15, %v698_v57 }
 0x222   : > { %v711_v1 = vand.u32 15, %v699_v60  ;;  %vm1346_vm7 = vcmp.ne.s32.totalorder %v704_v63, 0  ;;  %vm1358_vm11 = vcmp.ne.s32.totalorder %v704_v63, 15 }
 0x224   : > { %v571_v2 = vpop.f32.mrb[8].mxu0  ;;  %v757_v10 = vld [vmem:[#allocation3 + $0x58] sm:$0xf]  ;;  %vm1350_vm8 = vcmp.ne.s32.totalorder %v711_v1, 0  ;;  %vm1354_vm10 = vcmp.ne.s32.totalorder %v711_v1, 15 }
 0x225   : > { %v648_v3 = vpop.f32.mrb[8].mxu1  ;;  %v759_v4 = vld [vmem:[#allocation3 + $0x68] sm:$0xf]  ;;  %v758_v5 = vld [vmem:[#allocation3 + $0x60] sm:$0xf]  ;;  %682 = vst [vmem:[#allocation3 + $0xa8] sm:$0xff] %v571_v2 }
 0x226   : > { %v573_v6 = vpop.f32.mrb[9].mxu0  ;;  %684 = vst.msk [vmem:[#allocation3 + $0xb8] sm:$0xff] %vm501_vm4, %v648_v3  ;;  %771 = vrot.lane.b32.xlu1 %v759_v4, %s1197_s26  ;;  %v1083_v7 = vpop.f32.mrb[9].mxu1  ;;  %769 = vrot.lane.b32.xlu0 %v758_v5, %s1197_s26  ;;  %v782_v16 = vld [vmem:[#allocation3 + $0x80] sm:$0xf] }
 0x227   : > { %683 = vst [vmem:[#allocation3 + $0xb0] sm:$0xff] %v573_v6  ;;  %v575_v8 = vpop.f32.mrb[10].mxu0  ;;  %v651_v9 = vpop.f32.mrb[10].mxu1  ;;  %v784_v13 = vld [vmem:[#allocation3 + $0x90] sm:$0xf] }
 0x228   : > { %685 = vst [vmem:[#allocation3 + $0xd0] sm:$0xff] %v575_v8  ;;  %v577_v11 = vpop.f32.mrb[11].mxu0  ;;  %687 = vst.msk [vmem:[#allocation3 + $0xe0] sm:$0xff] %vm501_vm4, %v651_v9  ;;  %v1084_v12 = vpop.f32.mrb[11].mxu1  ;;  %v783_v15 = vld [vmem:[#allocation3 + $0x88] sm:$0xf] }
 0x229   : > { %686 = vst [vmem:[#allocation3 + $0xd8] sm:$0xff] %v577_v11 }
 0x22a   : > { %767 = vrot.lane.b32.xlu1 %v757_v10, %s1197_s26  ;;  %792 = vrot.lane.b32.xlu0 %v784_v13, %s1198_s27 }
 0x22c   : > { %v581_v14 = vpop.f32.mrb[12].mxu0  ;;  %v803_v17 = vld [vmem:[#allocation3 + $0xa8] sm:$0xf] }
 0x22d   : > { %v656_v19 = vpop.f32.mrb[12].mxu1  ;;  %688 = vst [vmem:[#allocation3 + $0xf8] sm:$0xff] %v581_v14  ;;  %v583_v20 = vpop.f32.mrb[13].mxu0  ;;  %v805_v23 = vld [vmem:[#allocation3 + $0xb8] sm:$0xf] }
 0x22e   : > { %790 = vrot.lane.b32.xlu1 %v783_v15, %s1198_s27  ;;  %788 = vrot.lane.b32.xlu0 %v782_v16, %s1198_s27  ;;  %690 = vst.msk [vmem:[#allocation3 + $0x108] sm:$0xff] %vm501_vm4, %v656_v19  ;;  %v1087_v21 = vpop.f32.mrb[13].mxu1  ;;  %689 = vst [vmem:[#allocation3 + $0x100] sm:$0xff] %v583_v20  ;;  %v585_v22 = vpop.f32.mrb[14].mxu0  ;;  %v804_v25 = vld [vmem:[#allocation3 + $0xb0] sm:$0xf] }
 0x22f   : > { %v659_v24 = vpop.f32.mrb[14].mxu1  ;;  %691 = vst [vmem:[#allocation3 + $0x120] sm:$0xff] %v585_v22  ;;  %v587_v26 = vpop.f32.mrb[15].mxu0  ;;  %v824_v27 = vld [vmem:[#allocation3 + $0xe0] sm:$0xf] }
 0x230   : > { %693 = vst.msk [vmem:[#allocation3 + $0x130] sm:$0xff] %vm501_vm4, %v659_v24  ;;  %v1088_v29 = vpop.f32.mrb[15].mxu1  ;;  %692 = vst [vmem:[#allocation3 + $0x128] sm:$0xff] %v587_v26  ;;  %v823_v36 = vld [vmem:[#allocation3 + $0xd8] sm:$0xf] }
 0x231   : > { %v822_v37 = vld [vmem:[#allocation3 + $0xd0] sm:$0xf]  ;;  %v754_v21 = vld [vmem:[#allocation3 + $0x38] sm:$0xf] }
 0x232   : > { %813 = vrot.lane.b32.xlu1 %v805_v23, %s1199_s28  ;;  %811 = vrot.lane.b32.xlu0 %v804_v25, %s1199_s28  ;;  %v753_v16 = vld [vmem:[#allocation3 + $0x30] sm:$0xf] }
 0x234   : > { %v591_v30 = vpop.f32.mrb[16].mxu0  ;;  %v843_v40 = vld [vmem:[#allocation3 + $0xf8] sm:$0xf] }
 0x235   : > { %694 = vst [vmem:[#allocation3 + $0x148] sm:$0xff] %v591_v30  ;;  %v593_v31 = vpop.f32.mrb[17].mxu0  ;;  %v664_v18 = vpop.f32.mrb[16].mxu1  ;;  %v845_v38 = vld [vmem:[#allocation3 + $0x108] sm:$0xf] }
 0x236   : > { %809 = vrot.lane.b32.xlu1 %v803_v17, %s1199_s28  ;;  %832 = vrot.lane.b32.xlu0 %v824_v27, %s1200_s29  ;;  %695 = vst [vmem:[#allocation3 + $0x150] sm:$0xff] %v593_v31  ;;  %v595_v28 = vpop.f32.mrb[18].mxu0  ;;  %696 = vst.msk [vmem:[#allocation3 + $0x158] sm:$0xff] %vm501_vm4, %v664_v18  ;;  %v1091_v32 = vpop.f32.mrb[17].mxu1  ;;  %v844_v39 = vld [vmem:[#allocation3 + $0x100] sm:$0xf] }
 0x237   : > { %v596_v33 = vpop.f32.mrb[19].mxu0  ;;  %v667_v34 = vpop.f32.mrb[18].mxu1  ;;  %v865_v41 = vld [vmem:[#allocation3 + $0x128] sm:$0xf]  ;;  %v866_v43 = vld [vmem:[#allocation3 + $0x130] sm:$0xf] }
 0x238   : > { %v1092_v35 = vpop.f32.mrb[19].mxu1  ;;  %v864_v45 = vld [vmem:[#allocation3 + $0x120] sm:$0xf] }
 0x23a   : > { %830 = vrot.lane.b32.xlu1 %v823_v36, %s1200_s29  ;;  %828 = vrot.lane.b32.xlu0 %v822_v37, %s1200_s29 }
 0x23c   : > { %v883_v42 = vld [vmem:[#allocation3 + $0x148] sm:$0xf] }
 0x23d   : > { %v885_v44 = vld [vmem:[#allocation3 + $0x158] sm:$0xf]  ;;  %v884_v46 = vld [vmem:[#allocation3 + $0x150] sm:$0xf] }
 0x23e   : > { %853 = vrot.lane.b32.xlu1 %v845_v38, %s1201_s30  ;;  %851 = vrot.lane.b32.xlu0 %v844_v39, %s1201_s30 }
 0x242   : > { %849 = vrot.lane.b32.xlu1 %v843_v40, %s1201_s30  ;;  %872 = vrot.lane.b32.xlu0 %v865_v41, %s1202_s6 }
 0x246   : > { %874 = vrot.lane.b32.xlu1 %v866_v43, %s1202_s6  ;;  %889 = vrot.lane.b32.xlu0 %v883_v42, %s1203_s7 }
 0x24a   : > { %870 = vrot.lane.b32.xlu1 %v864_v45, %s1202_s6  ;;  %893 = vrot.lane.b32.xlu0 %v885_v44, %s1203_s7 }
 0x24e   : > { %891 = vrot.lane.b32.xlu1 %v884_v46, %s1203_s7 }
 0x28f   : > { %v741_v49 = vpop.permute.xlu1 %740 }
 0x290   : > { %v743_v50 = vpop.permute.xlu0 %742  ;;  %v745_v5 = vsel %vm744_vm5, %v739_v47, %v741_v49 }
 0x291   : > { %v746_v7 = vsel %vm744_vm5, %v741_v49, %v743_v50  ;;  %v749_v14 = vsel %vm1346_vm7, %v745_v5, 0.0 }
 0x292   : > { %v750_v15 = vsel %vm1350_vm8, %v746_v7, 0.0  ;;  %v755_v26 = vadd.f32 %v753_v16, %v749_v14 }
 0x293   : > { %v756_v29 = vadd.f32 %v754_v21, %v750_v15 }
 0x298   : > { %v772_v51 = vpop.permute.xlu1 %771  ;;  %v770_v52 = vpop.permute.xlu0 %769 }
 0x299   : > { %v775_v11 = vsel %vm773_vm6, %v770_v52, %v772_v51 }
 0x29a   : > { %v779_v22 = vsel %vm1354_vm10, %v775_v11, 0.0 }
 0x29b   : > { %v781_v27 = vadd.f32 %v779_v22, %v756_v29 }
 0x29c   : > { %v768_v53 = vpop.permute.xlu1 %767  ;;  %v793_v0 = vpop.permute.xlu0 %792 }
 0x29d   : > { %v774_v13 = vsel %vm773_vm6, %v768_v53, %v770_v52 }
 0x29e   : > { %v778_v23 = vsel %vm1358_vm11, %v774_v13, 0.0 }
 0x29f   : > { %v780_v31 = vadd.f32 %v778_v23, %v755_v26 }
 0x2a0   : > { %v791_v55 = vpop.permute.xlu1 %790  ;;  %v789_v56 = vpop.permute.xlu0 %788 }
 0x2a1   : > { %v796_v19 = vsel %vm794_vm9, %v791_v55, %v793_v0  ;;  %v795_v20 = vsel %vm794_vm9, %v789_v56, %v791_v55 }
 0x2a2   : > { %v800_v17 = vsel %vm1350_vm8, %v796_v19, 0.0  ;;  %v799_v30 = vsel %vm1346_vm7, %v795_v20, 0.0 }
 0x2a3   : > { %v802_v36 = vadd.f32 %v800_v17, %v781_v27  ;;  %v801_v37 = vadd.f32 %v799_v30, %v780_v31 }
 0x2a4   : > { %v814_v58 = vpop.permute.xlu1 %813  ;;  %v812_v59 = vpop.permute.xlu0 %811 }
 0x2a5   : > { %v817_v32 = vsel %vm815_vm13, %v812_v59, %v814_v58 }
 0x2a6   : > { %v821_v42 = vadd.f32 %v817_v32, %v802_v36 }
 0x2a8   : > { %v810_v61 = vpop.permute.xlu1 %809  ;;  %v833_v62 = vpop.permute.xlu0 %832 }
 0x2a9   : > { %v816_v33 = vsel %vm815_vm13, %v810_v61, %v812_v59 }
 0x2aa   : > { %v820_v43 = vadd.f32 %v816_v33, %v801_v37 }
 0x2ac   : > { %v831_v2 = vpop.permute.xlu1 %830  ;;  %v829_v3 = vpop.permute.xlu0 %828 }
 0x2ad   : > { %v836_v18 = vsel %vm834_vm12, %v831_v2, %v833_v62  ;;  %v835_v28 = vsel %vm834_vm12, %v829_v3, %v831_v2 }
 0x2ae   : > { %v840_v40 = vsel %vm1354_vm10, %v836_v18, 0.0  ;;  %v839_v41 = vsel %vm1358_vm11, %v835_v28, 0.0 }
 0x2af   : > { %v842_v47 = vadd.f32 %v840_v40, %v821_v42  ;;  %v841_v49 = vadd.f32 %v839_v41, %v820_v43 }
 0x2b0   : > { %v854_v8 = vpop.permute.xlu1 %853  ;;  %v852_v9 = vpop.permute.xlu0 %851 }
 0x2b1   : > { %v857_v38 = vsel %vm855_vm14, %v852_v9, %v854_v8 }
 0x2b2   : > { %v861_v44 = vsel %vm1350_vm8, %v857_v38, 0.0 }
 0x2b3   : > { %v863_v53 = vadd.f32 %v861_v44, %v842_v47 }
 0x2b4   : > { %v850_v24 = vpop.permute.xlu1 %849  ;;  %v873_v25 = vpop.permute.xlu0 %872 }
 0x2b5   : > { %v856_v39 = vsel %vm855_vm14, %v850_v24, %v852_v9 }
 0x2b6   : > { %v860_v45 = vsel %vm1346_vm7, %v856_v39, 0.0 }
 0x2b7   : > { %v862_v0 = vadd.f32 %v860_v45, %v841_v49 }
 0x2b8   : > { %v875_v34 = vpop.permute.xlu1 %874  ;;  %v890_v35 = vpop.permute.xlu0 %889 }
 0x2b9   : > { %v878_v50 = vsel %vm876_vm15, %v873_v25, %v875_v34 }
 0x2ba   : > { %v882_v55 = vadd.f32 %v878_v50, %v863_v53 }
 0x2bc   : > { %v871_v46 = vpop.permute.xlu1 %870  ;;  %v894_v52 = vpop.permute.xlu0 %893 }
 0x2bd   : > { %v877_v51 = vsel %vm876_vm15, %v871_v46, %v873_v25 }
 0x2be   : > { %v881_v56 = vadd.f32 %v877_v51, %v862_v0 }
 0x2c0   : > { %v892_v54 = vpop.permute.xlu1 %891 }
 0x2c1   : > { %v896_v57 = vsel %vm895_vm0, %v890_v35, %v892_v54  ;;  %v897_v58 = vsel %vm895_vm0, %v892_v54, %v894_v52 }
 0x2c2   : > { %v900_v59 = vsel %vm1358_vm11, %v896_v57, 0.0  ;;  %v901_v60 = vsel %vm1354_vm10, %v897_v58, 0.0 }
 0x2c3   : > { %v902_v61 = vadd.f32 %v900_v59, %v881_v56  ;;  %v903_v62 = vadd.f32 %v901_v60, %v882_v55 }
 0x2c5   : > { %v910_v63 = vadd.f32 %v1344_v48, %v902_v61  ;;  %v911_v1 = vadd.f32 %v1344_v48, %v903_v62 }
 0x2c7   : > { %v914_v2 = vcombine.low %v910_v63, %v911_v1 }
 0x2c9   : > { %916 = vst [vmem:[%s302_s11] sm:$0xff] %v914_v2 }
 0x2ca PF: > { %s15_s20 = sadd.s32 1, %s1190_s20   ;;  %s1415_s18 = smov %s1186_s19 }
 0x2cb   : > { %p12_p5 = scmp.ge.s32.totalorder %s15_s20, 4   ;;  %s1416_s19 = smov %s1418_s21 }
 0x2cd   :  { %14 = sbr.rel (!%p12_p5) target bundleno = 2 (0x2), region = 76 }

</bundles_post_ra>
